<compile_context>
chip_gen: v7x
topology: tpu7x:2x2x1
jax: 0.10.0
libtpu: 0.0.40
codegen_flags: <defaults>
</compile_context>

<pallas_src>
import functools

import jax
import jax.numpy as jnp
from jax import lax
from jax.experimental import pallas as pl
from jax.experimental.pallas import tpu as pltpu


def _disc_conv_kernel(xa_ref, xb_ref, w_ref, b_ref, o_ref, *, stride, ws, cin, tm):
    """Computes one (tm, Coutp) output tile.

    xa_ref: (tm, Cs)          current row tile of the flat space-to-depth input (bf16)
    xb_ref: (halo_rows, Cs)   rows immediately after the tile (halo for shifted taps)
    w_ref : (9*cin, Coutp)    bf16 weight with the BN scale folded in
    b_ref : (1, Coutp)        f32 fused bias  ((conv_bias - mean)*scale + beta)
    o_ref : (tm, Coutp)       f32 output tile
    """
    s = stride
    cols = []
    for di in range(3):
        for dj in range(3):
            # In the space-to-depth flattened layout, tap (di, dj) is a constant
            # row shift plus a static channel (parity) slice.
            off = (di // s) * ws + (dj // s)
            c0 = ((di % s) * s + (dj % s)) * cin
            if off == 0:
                piece = xa_ref[:, c0:c0 + cin]
            else:
                piece = jnp.concatenate(
                    [xa_ref[off:tm, c0:c0 + cin], xb_ref[0:off, c0:c0 + cin]],
                    axis=0)
            cols.append(piece)
    # (tm, 9*cin) patch in the MXU dtype; accumulate in f32 on the MXU.
    patch = jnp.concatenate(cols, axis=-1).astype(w_ref.dtype)
    y = jnp.dot(patch, w_ref[...], preferred_element_type=jnp.float32)
    y = y + b_ref[...]                                        # conv bias + BN (eval)
    o_ref[...] = jnp.maximum(y, 0.2 * y).astype(o_ref.dtype)  # LeakyReLU(0.2)


def disc_conv_block(x_nchw, weight, conv_bias, gamma, beta, run_mean, run_var,
                    *, stride, eps=1e-5, tm=None, mxu_dtype=jnp.bfloat16):
    N, Cin, H, W = x_nchw.shape
    Cout, Cin_w, KH, KW = weight.shape
    assert (KH, KW) == (3, 3) and Cin_w == Cin
    s = int(stride)

    Ho = (H + 2 - KH) // s + 1
    Wo = (W + 2 - KW) // s + 1

    # NCHW -> NHWC, conv padding=1, then pad H/W up to a multiple of the stride.
    x = jnp.transpose(x_nchw, (0, 2, 3, 1)).astype(jnp.float32)
    Hp, Wp = H + 2, W + 2
    Hs, Ws = -(-Hp // s), -(-Wp // s)
    xp = jnp.pad(x, ((0, 0), (1, Hs * s - Hp + 1), (1, Ws * s - Wp + 1), (0, 0)))

    # Space-to-depth by the stride (identity permutation for stride=1), fused with
    # the bf16 cast (same numerics as the previous in-kernel cast, half the bytes):
    #   xs[n, qh, qw, (ph*s + pw)*Cin + c] = xp[n, qh*s + ph, qw*s + pw, c]
    Cs = s * s * Cin
    xs = (xp.reshape(N, Hs, s, Ws, s, Cin)
            .transpose(0, 1, 3, 2, 4, 5)
            .reshape(N, Hs, Ws, Cs)).astype(mxu_dtype)

    # Flatten rows (n, qh, qw).  Every tap is a constant row shift <= off_max.
    Mtot = N * Hs * Ws
    off_max = (2 // s) * Ws + (2 // s)
    halo_rows = max(128, -(-off_max // 128) * 128)     # smallest 128-multiple cover

    # Weight (Cout, Cin, 3, 3) -> (9*Cin, Cout), fold BN scale, pad Cout to 128 lanes.
    scale = gamma / jnp.sqrt(run_var + eps)
    w2 = jnp.transpose(weight, (2, 3, 1, 0)).reshape(KH * KW * Cin, Cout)
    w2 = (w2 * scale[None, :]).astype(mxu_dtype)
    bias = ((conv_bias - run_mean) * scale + beta).astype(jnp.float32)
    Coutp = ((Cout + 127) // 128) * 128
    w2 = jnp.pad(w2, ((0, 0), (0, Coutp - Cout)))
    bias = jnp.pad(bias, (0, Coutp - Cout)).reshape(1, Coutp)

    if tm is None:
        # Budget ~8 MiB for all tm-scaled VMEM buffers:
        # bf16 input dbl-buffer + bf16 patch temp + f32 output dbl-buffer (+ y temp).
        per_row = Cs * 2 * 2 + KH * KW * Cin * 2 + Coutp * 4 * 3
        tm = min(4096, max(256, (8 << 20) // max(1, per_row)))
    tm = max(128, (tm // 128) * 128)
    tm = -(-tm // halo_rows) * halo_rows               # halo index_map needs tm % halo_rows == 0

    n_tiles = -(-Mtot // tm)
    rows_pad = (n_tiles + 1) * tm                      # divisible by tm and halo_rows
    xs_flat = jnp.pad(xs.reshape(Mtot, Cs), ((0, rows_pad - Mtot), (0, 0)))

    halo_blocks_per_tile = tm // halo_rows

    kernel = functools.partial(_disc_conv_kernel, stride=s, ws=Ws, cin=Cin, tm=tm)
    out_flat = pl.pallas_call(
        kernel,
        out_shape=jax.ShapeDtypeStruct((n_tiles * tm, Coutp), jnp.float32),
        grid_spec=pltpu.PrefetchScalarGridSpec(
            num_scalar_prefetch=0,
            grid=(n_tiles,),
            in_specs=[
                pl.BlockSpec((tm, Cs), lambda i: (i, 0)),                 # current rows
                pl.BlockSpec((halo_rows, Cs),                             # small halo
                             lambda i: ((i + 1) * halo_blocks_per_tile, 0)),
                pl.BlockSpec((KH * KW * Cin, Coutp), lambda i: (0, 0)),   # resident W
                pl.BlockSpec((1, Coutp), lambda i: (0, 0)),
            ],
            out_specs=pl.BlockSpec((tm, Coutp), lambda i: (i, 0)),
        ),
        compiler_params=pltpu.CompilerParams(
            dimension_semantics=("parallel",),
            vmem_limit_bytes=64 * 1024 * 1024,
        ),
    )(xs_flat, xs_flat, w2, bias)

    # Drop garbage rows/cols (padded spatial grid + padded channels) and go to NCHW.
    out = out_flat[:Mtot].reshape(N, Hs, Ws, Coutp)[:, :Ho, :Wo, :Cout]
    # Dropout2d(p=0.5) is identity in eval mode.
    # TODO(synk): training-mode Dropout2d (per-channel mask via pltpu.prng_*) and
    # training-mode BatchNorm batch statistics are not implemented (eval-only).
    return jnp.transpose(out, (0, 3, 1, 2))


def _reference(x, w, b, gamma, beta, mean, var, stride, eps=1e-5):
    y = lax.conv_general_dilated(x, w, window_strides=(stride, stride),
                                 padding=((1, 1), (1, 1)),
                                 dimension_numbers=("NCHW", "OIHW", "NCHW"))
    y = y + b.reshape(1, -1, 1, 1)
    y = (y - mean.reshape(1, -1, 1, 1)) / jnp.sqrt(var.reshape(1, -1, 1, 1) + eps)
    y = y * gamma.reshape(1, -1, 1, 1) + beta.reshape(1, -1, 1, 1)
    return jnp.where(y > 0, y, 0.2 * y)


if __name__ == "__main__":
    key = jax.random.PRNGKey(0)
    k_x, k_w, k_b = jax.random.split(key, 3)

    N, Cin, H, W = 2, 4, 16, 16
    Cout = 8

    x = jax.random.normal(k_x, (N, Cin, H, W), dtype=jnp.float32)
    weight = 0.1 * jax.random.normal(k_w, (Cout, Cin, 3, 3), dtype=jnp.float32)
    conv_bias = 0.05 * jax.random.normal(k_b, (Cout,), dtype=jnp.float32)
    # deterministic BatchNorm parameters / running stats
    gamma = 1.0 + 0.1 * jnp.arange(Cout, dtype=jnp.float32)
    beta = 0.01 * jnp.arange(Cout, dtype=jnp.float32)
    run_mean = 0.02 * jnp.arange(Cout, dtype=jnp.float32)
    run_var = 1.0 + 0.05 * jnp.arange(Cout, dtype=jnp.float32)

    # tm=128 exercises the multi-tile halo path; tm=None exercises auto-sizing.
    for stride, tile in ((2, 128), (1, 128), (1, None)):
        out = disc_conv_block(x, weight, conv_bias, gamma, beta, run_mean, run_var,
                              stride=stride, tm=tile)
        out = jax.block_until_ready(out)

        ref = _reference(x, weight, conv_bias, gamma, beta, run_mean, run_var, stride)
        Ho = (H - 1) // stride + 1
        assert out.shape == ref.shape == (N, Cout, Ho, Ho)
        # bf16 MXU operands -> loosened tolerance vs the f32 reference.
        assert jnp.allclose(out, ref, atol=5e-2, rtol=5e-2), (
            float(jnp.max(jnp.abs(out - ref))))

    print("KERNEL_OK")
</pallas_src>

<mosaic_0001>
module attributes {stable_mosaic.version = 11 : i64} {
  func.func @_disc_conv_kernel(%arg0: i32, %arg1: memref<128x16xbf16, #tpu.memory_space<vmem>>, %arg2: memref<128x16xbf16, #tpu.memory_space<vmem>>, %arg3: memref<36x128xbf16, #tpu.memory_space<vmem>>, %arg4: memref<1x128xf32, #tpu.memory_space<vmem>>, %arg5: memref<128x128xf32, #tpu.memory_space<vmem>>) attributes {dimension_semantics = [#tpu.dimension_semantics<parallel>], iteration_bounds = array<i64: 2>, scalar_prefetch = 0 : i64, scratch_operands = 0 : i64, tpu.core_type = #tpu.core_type<tc>, window_params = [{transform_indices = @transform_0, window_bounds = array<i64: 128, 16>}, {transform_indices = @transform_1, window_bounds = array<i64: 128, 16>}, {pipeline_mode = #tpu.pipeline_mode<synchronous>, transform_indices = @transform_2, window_bounds = array<i64: 36, 128>}, {pipeline_mode = #tpu.pipeline_mode<synchronous>, transform_indices = @transform_3, window_bounds = array<i64: 1, 128>}, {transform_indices = @transform_4, window_bounds = array<i64: 128, 128>}]} {
    %c0 = arith.constant 0 : index
    %c0_0 = arith.constant 0 : index
    %0 = vector.load %arg1[%c0, %c0_0] : memref<128x16xbf16, #tpu.memory_space<vmem>>, vector<128x4xbf16>
    %c0_1 = arith.constant 0 : index
    %c4 = arith.constant 4 : index
    %1 = vector.load %arg1[%c0_1, %c4] : memref<128x16xbf16, #tpu.memory_space<vmem>>, vector<128x4xbf16>
    %c1 = arith.constant 1 : index
    %c0_2 = arith.constant 0 : index
    %2 = vector.load %arg1[%c1, %c0_2] : memref<128x16xbf16, #tpu.memory_space<vmem>>, vector<127x4xbf16>
    %c0_3 = arith.constant 0 : index
    %c0_4 = arith.constant 0 : index
    %3 = vector.load %arg2[%c0_3, %c0_4] : memref<128x16xbf16, #tpu.memory_space<vmem>>, vector<1x4xbf16>
    %4 = tpu.concatenate %2, %3 in 0 : vector<127x4xbf16>, vector<1x4xbf16> -> vector<128x4xbf16>
    %c0_5 = arith.constant 0 : index
    %c8 = arith.constant 8 : index
    %5 = vector.load %arg1[%c0_5, %c8] : memref<128x16xbf16, #tpu.memory_space<vmem>>, vector<128x4xbf16>
    %c0_6 = arith.constant 0 : index
    %c12 = arith.constant 12 : index
    %6 = vector.load %arg1[%c0_6, %c12] : memref<128x16xbf16, #tpu.memory_space<vmem>>, vector<128x4xbf16>
    %c1_7 = arith.constant 1 : index
    %c8_8 = arith.constant 8 : index
    %7 = vector.load %arg1[%c1_7, %c8_8] : memref<128x16xbf16, #tpu.memory_space<vmem>>, vector<127x4xbf16>
    %c0_9 = arith.constant 0 : index
    %c8_10 = arith.constant 8 : index
    %8 = vector.load %arg2[%c0_9, %c8_10] : memref<128x16xbf16, #tpu.memory_space<vmem>>, vector<1x4xbf16>
    %9 = tpu.concatenate %7, %8 in 0 : vector<127x4xbf16>, vector<1x4xbf16> -> vector<128x4xbf16>
    %c9 = arith.constant 9 : index
    %c0_11 = arith.constant 0 : index
    %10 = vector.load %arg1[%c9, %c0_11] : memref<128x16xbf16, #tpu.memory_space<vmem>>, vector<119x4xbf16>
    %c0_12 = arith.constant 0 : index
    %c0_13 = arith.constant 0 : index
    %11 = vector.load %arg2[%c0_12, %c0_13] : memref<128x16xbf16, #tpu.memory_space<vmem>>, vector<9x4xbf16>
    %12 = tpu.concatenate %10, %11 in 0 : vector<119x4xbf16>, vector<9x4xbf16> -> vector<128x4xbf16>
    %c9_14 = arith.constant 9 : index
    %c4_15 = arith.constant 4 : index
    %13 = vector.load %arg1[%c9_14, %c4_15] : memref<128x16xbf16, #tpu.memory_space<vmem>>, vector<119x4xbf16>
    %c0_16 = arith.constant 0 : index
    %c4_17 = arith.constant 4 : index
    %14 = vector.load %arg2[%c0_16, %c4_17] : memref<128x16xbf16, #tpu.memory_space<vmem>>, vector<9x4xbf16>
    %15 = tpu.concatenate %13, %14 in 0 : vector<119x4xbf16>, vector<9x4xbf16> -> vector<128x4xbf16>
    %c10 = arith.constant 10 : index
    %c0_18 = arith.constant 0 : index
    %16 = vector.load %arg1[%c10, %c0_18] : memref<128x16xbf16, #tpu.memory_space<vmem>>, vector<118x4xbf16>
    %c0_19 = arith.constant 0 : index
    %c0_20 = arith.constant 0 : index
    %17 = vector.load %arg2[%c0_19, %c0_20] : memref<128x16xbf16, #tpu.memory_space<vmem>>, vector<10x4xbf16>
    %18 = tpu.concatenate %16, %17 in 0 : vector<118x4xbf16>, vector<10x4xbf16> -> vector<128x4xbf16>
    %19 = tpu.concatenate %0, %1, %4, %5, %6, %9, %12, %15, %18 in 1 : vector<128x4xbf16>, vector<128x4xbf16>, vector<128x4xbf16>, vector<128x4xbf16>, vector<128x4xbf16>, vector<128x4xbf16>, vector<128x4xbf16>, vector<128x4xbf16>, vector<128x4xbf16> -> vector<128x36xbf16>
    %c0_21 = arith.constant 0 : index
    %c0_22 = arith.constant 0 : index
    %20 = vector.load %arg3[%c0_21, %c0_22] : memref<36x128xbf16, #tpu.memory_space<vmem>>, vector<36x128xbf16>
    %cst = arith.constant dense<0.000000e+00> : vector<128x128xf32>
    %21 = tpu.matmul %19, %20, %cst {dimension_numbers = #tpu.dot_dimension_numbers<[1], [0], [0], [1], [0, 0, 1, 1], [], []>} : vector<128x36xbf16>, vector<36x128xbf16>, vector<128x128xf32> -> vector<128x128xf32>
    %c0_23 = arith.constant 0 : index
    %c0_24 = arith.constant 0 : index
    %22 = vector.load %arg4[%c0_23, %c0_24] : memref<1x128xf32, #tpu.memory_space<vmem>>, vector<1x128xf32>
    %23 = vector.broadcast %22 : vector<1x128xf32> to vector<128x128xf32>
    %24 = arith.addf %21, %23 : vector<128x128xf32>
    %cst_25 = arith.constant 2.000000e-01 : f32
    %25 = vector.broadcast %cst_25 : f32 to vector<128x128xf32>
    %26 = arith.mulf %25, %24 : vector<128x128xf32>
    %27 = arith.maximumf %24, %26 : vector<128x128xf32>
    %c0_26 = arith.constant 0 : index
    %c0_27 = arith.constant 0 : index
    %28 = vector.load %arg5[%c0_26, %c0_27] : memref<128x128xf32, #tpu.memory_space<vmem>>, vector<128x128xf32>
    tpu.vector_store %arg5[%c0_26, %c0_27], %27 {strides = array<i32>} : memref<128x128xf32, #tpu.memory_space<vmem>>, vector<128x128xf32>,
    return
  }
  func.func @transform_0(%arg0: i32) -> (i32, i32) {
    %c0_i32 = arith.constant 0 : i32
    %c0_i32_0 = arith.constant 0 : i32
    return %arg0, %c0_i32 : i32, i32
  }
  func.func @transform_1(%arg0: i32) -> (i32, i32) {
    %c1_i32 = arith.constant 1 : i32
    %0 = arith.addi %arg0, %c1_i32 : i32
    %c1_i32_0 = arith.constant 1 : i32
    %1 = arith.muli %0, %c1_i32_0 : i32
    %c0_i32 = arith.constant 0 : i32
    %c0_i32_1 = arith.constant 0 : i32
    return %1, %c0_i32 : i32, i32
  }
  func.func @transform_2(%arg0: i32) -> (i32, i32) {
    %c0_i32 = arith.constant 0 : i32
    %c0_i32_0 = arith.constant 0 : i32
    %c0_i32_1 = arith.constant 0 : i32
    return %c0_i32, %c0_i32_0 : i32, i32
  }
  func.func @transform_3(%arg0: i32) -> (i32, i32) {
    %c0_i32 = arith.constant 0 : i32
    %c0_i32_0 = arith.constant 0 : i32
    %c0_i32_1 = arith.constant 0 : i32
    return %c0_i32, %c0_i32_0 : i32, i32
  }
  func.func @transform_4(%arg0: i32) -> (i32, i32) {
    %c0_i32 = arith.constant 0 : i32
    %c0_i32_0 = arith.constant 0 : i32
    return %arg0, %c0_i32 : i32, i32
  }
}

</mosaic_0001>

<bundles_post_ra>
// kernel: tpu_custom_call.1
= control target key start
LH: loop header
LB: loop body
LE: loop exit
PB: predicated region body
PF: predicated region fallthrough
CT: control target
= control target key end

     0   :  { %s2186_s0 = inlined_call_operand.hbm [shape: bf16[384,16], index: 0, kind: input, shape index: {}]   ;;  %s2187_s1 = inlined_call_operand.hbm [shape: bf16[384,16], index: 1, kind: input, shape index: {}]   ;;  %s2188_s2 = inlined_call_operand.hbm [shape: bf16[36,128], index: 2, kind: input, shape index: {}]   ;;  %s2189_s3 = inlined_call_operand.hbm [shape: f32[1,128], index: 3, kind: input, shape index: {}]   ;;  %s2190_s4 = inlined_call_operand.hbm [shape: f32[256,128], index: 4, kind: output, shape index: {}]  }
   0x1   :  { %2202 = sst [smem:[#allocation18_spill]] %s2186_s0 }
   0x2   :  { %2203 = sst [smem:[#allocation19_spill]] %s2188_s2 }
   0x3   :  { %2204 = sst [smem:[#allocation20_spill]] %s2189_s3 }
   0x4   :  { %9 = vsyncpa [#allocation3], 0 }
   0x5   :  { %11 = vsyncpa [#allocation3 + $0x1], 0 }
   0x6   :  { %12 = vsyncpa [#allocation6], 0 }
   0x7   :  { %14 = vsyncpa [#allocation6 + $0x1], 0 }
   0x8   :  { %15 = vsyncpa [#allocation9], 0 }
   0x9   :  { %16 = vsyncpa [#allocation4], 0 }
   0xa   :  { %18 = vsyncpa [#allocation4 + $0x1], 0  ;;  %s1530_s15 = smov 0   ;;  %s1532_s16 = smov 0  }
   0xb   :  { %s1534_s17 = smov 0   ;;  %s1536_s18 = smov 0  }
   0xc   :  { %s1538_s19 = smov 0   ;;  %s1540_s20 = smov 0  }
   0xd   :  { %s1542_s21 = smov 0  }
   0xe LB: > { %2205 = sst [smem:[#allocation16_spill]] %s1486_s20  ;;  %s1564_s22 = sadd.s32 4294967295, %s1490_s21   ;;  %s1490_s21 = sphi %s1542_s21, %s2239_s21   ;;  %s1486_s20 = sphi %s1540_s20, %s2233_s20   ;;  %s1482_s19 = sphi %s1538_s19, %s2238_s19   ;;  %s1478_s18 = sphi %s1536_s18, %s2237_s18   ;;  %s1474_s17 = sphi %s1534_s17, %s2236_s17   ;;  %s1470_s16 = sphi %s1532_s16, %s2235_s16   ;;  %s1466_s15 = sphi %s1530_s15, %s2234_s15  }
   0xf   : > { %s1050_s23 = sadd.s32 4294967294, %s1490_s21   ;;  %p44_p0 = scmp.ne.s32.totalorder %s1482_s19, %s1478_s18 }
  0x10   : > { %p2191_p1 = scmp.eq.s32.totalorder %s1564_s22, 0  ;;  %p72_p2 = scmp.ne.s32.totalorder %s1470_s16, %s1466_s15 }
  0x11   : > { %p144_p5 = scmp.eq.s32.totalorder %s1050_s23, 1  ;;  %p1051_p7 = scmp.ge.s32.totalorder %s1490_s21, 1 }
  0x12   : > { %p1574_p4 = por %p2191_p1, %p44_p0  ;;  %p1580_p6 = por %p72_p2, %p2191_p1 }
  0x13   : > { %p1585_p8 = por %p144_p5, %p44_p0  ;;  %p151_p9 = scmp.lt.s32.totalorder %s1490_s21, 3 }
  0x14   : > { %s2206_s24 = scalar_select %p1574_p4, 1, 0 }
  0x15   : > { %s2207_s25 = scalar_select %p1580_p6, 1, 0 }
  0x16   : > { %s2208_s26 = scalar_select %p1585_p8, 1, 0 }
  0x17   : > { %p1590_p10 = pnand %p1051_p7, %p151_p9  ;;  %s1492_s28 = smov [#allocation7]  }
  0x18   : > { %s163_s29 = sshll.u32 %s1492_s28, 4  ;;  %s1493_s5 = smov [#allocation8]   ;;  %s1594_s29 = int_to_ptr.vmem [resolvable:$true] %s163_s29 }
  0x19   : > { %p1159_p11 = pneg %p1590_p10  ;;  %s177_s6 = sshll.u32 %s1493_s5, 4  ;;  %s1605_s6 = int_to_ptr.vmem [resolvable:$true] %s177_s6 }
  0x1a   : > { %s2211_s2 = sld [smem:[#allocation19_spill]] }
  0x1b   : > { %p1601_p13 = pnand %p1159_p11, %p2191_p1 }
  0x1d   : > { %p1273_p2 = pneg %p1601_p13 }
  0x20   : > { %s1271_s9 = scalar_lea.hbm %s2211_s2, 320 }
  0x21   : > { %p1272_p0 = scmp.ne.s32.totalorder %s2211_s2, %s1271_s9  ;;  %p1278_p9 = scmp.lt.u32.totalorder %s1271_s9, %s2211_s2 }
  0x23   : > { %p1274_p5 = pnand %p1273_p2, %p1272_p0 }
  0x25   : > { %p1275_p7 = pneg %p1274_p5 }
  0x27   : > { %p1280_p11 = pnand %p1278_p9, %p1275_p7 }
  0x29   : > { %1283 = shalt.err (!%p1280_p11)
}
  0x2a   : > { %s1284_s14 = scalar_lea.vmem %s1594_s29, 320  ;;  %p1292_p8 = scmp.lt.s32.totalorder %s1594_s29, %s1594_s29 }
  0x2b   : > { %p1285_p12 = scmp.ne.s32.totalorder %s1594_s29, %s1284_s14  ;;  %p1293_p0 = scmp.lt.s32.totalorder %s1284_s14, %s1284_s14 }
  0x2d   : > { %p1287_p1 = pnand %p1285_p12, %p1273_p2  ;;  %p1294_p5 = por %p1293_p0, %p1292_p8 }
  0x2f   : > { %p1288_p3 = pneg %p1287_p1 }
  0x31   : > { %p1295_p6 = pnand %p1294_p5, %p1288_p3 }
  0x33   : > { %1298 = shalt.err (!%p1295_p6)
}
  0x34   : > { %s2193_s15 = smov 64   ;;  %s2195_s23 = smov 4  }
  0x35   : > { %1162 = dma.hbm_to_vmem [thread:$0]  (!%p1601_p13), %s2211_s2, 320, %s1594_s29, [#allocation6], %s2193_s15, %s2193_s15, %s2195_s23  }
  0x36   : > { %s2212_s3 = sld [smem:[#allocation20_spill]] }
  0x3c   : > { %s1299_s9 = scalar_lea.hbm %s2212_s3, 16 }
  0x3d   : > { %p1300_p1 = scmp.ne.s32.totalorder %s2212_s3, %s1299_s9  ;;  %p1306_p8 = scmp.lt.u32.totalorder %s1299_s9, %s2212_s3 }
  0x3f   : > { %p1302_p3 = pnand %p1300_p1, %p1273_p2 }
  0x41   : > { %p1303_p6 = pneg %p1302_p3 }
  0x43   : > { %p1308_p12 = pnand %p1306_p8, %p1303_p6 }
  0x45   : > { %1311 = shalt.err (!%p1308_p12)
}
  0x46   : > { %s1312_s29 = scalar_lea.vmem %s1605_s6, 16  ;;  %s1319_s14 = scalar_lea.vmem %s1605_s6, 32 }
  0x47   : > { %p1313_p7 = scmp.ne.s32.totalorder %s1605_s6, %s1312_s29  ;;  %p1320_p0 = scmp.lt.s32.totalorder %s1605_s6, %s1605_s6 }
  0x48   : > { %p1321_p5 = scmp.lt.s32.totalorder %s1319_s14, %s1312_s29 }
  0x49   : > { %p1315_p9 = pnand %p1313_p7, %p1273_p2 }
  0x4a   : > { %p1322_p1 = por %p1321_p5, %p1320_p0 }
  0x4b   : > { %p1316_p11 = pneg %p1315_p9 }
  0x4d   : > { %p1323_p3 = pnand %p1322_p1, %p1316_p11 }
  0x4f   : > { %1326 = shalt.err (!%p1323_p3)
}
  0x50   : > { %1165 = dma.hbm_to_vmem [thread:$0]  (!%p1601_p13), %s2212_s3, 16, %s1605_s6, [#allocation9]  }
  0x51   : > { %s1664_s7 = sadd.s32 1, %s1490_s21   ;;  %s31_s30 = sadd.s32 1, %s1486_s20 }
  0x52   : > { %s28_s8 = ssub.s32 %s1490_s21, %s1664_s7  ;;  %p38_p2 = scmp.ne.s32.totalorder %s1486_s20, %s1482_s19 }
  0x53   : > { %p29_p6 = scmp.eq.s32.totalorder %s28_s8, 0  ;;  %p2198_p8 = scmp.eq.s32.totalorder %s1490_s21, 0 }
  0x54   : > { %p2213_p12 = scmp.eq.s32.totalorder %s1564_s22, 1  ;;  %p2197_p9 = scmp.lt.s32.totalorder %s1490_s21, 2 }
  0x55   : > { %s1680_s10 = scalar_select %p29_p6, %s1486_s20, %s31_s30  }
  0x56   : > { %p1674_p7 = por %p2213_p12, %p38_p2  ;;  %p40_p11 = por %p2198_p8, %p38_p2 }
  0x57   : > { %2215 = sst [smem:[#allocation17_spill]] %s1680_s10  ;;  %s188_s6 = sand.u32 1, %s1486_s20  }
  0x58   : > { %s2214_s9 = scalar_select %p1674_p7, 1, 0 }
  0x59   : > { %s1055_s11 = sshll.u32 %s188_s6, 6  ;;  %s1102_s12 = sshll.u32 %s1490_s21, 10 }
  0x5a   : > { %s2216_s0 = sld [smem:[#allocation18_spill]]  ;;  %s192_s28 = scalar_lea.vmem [#allocation2], %s1055_s11 }
  0x5b   : > { %s199_s5 = sshll.u32 %s192_s28, 4  ;;  %p1695_p13 = pnand %p2197_p9, %p40_p11  ;;  %s1691_s5 = int_to_ptr.vmem [resolvable:$true] %s199_s5 }
  0x5c   : > { %s1702_s13 = scalar_lea.hbm %s2187_s1, %s1102_s12  ;;  %s1704_s29 = scalar_lea.sflag [#allocation3], %s188_s6 }
  0x5d   : > { %p1329_p5 = pneg %p1695_p13 }
  0x60   : > { %s1689_s14 = scalar_lea.hbm %s2216_s0, %s1102_s12  ;;  %s1332_s2 = scalar_lea.hbm %s2216_s0, 3072 }
  0x61   : > { %s1327_s23 = scalar_lea.hbm %s1689_s14, 1024  ;;  %p1333_p2 = scmp.lt.u32.totalorder %s1689_s14, %s2216_s0 }
  0x62   : > { %p1328_p0 = scmp.ne.s32.totalorder %s1689_s14, %s1327_s23  ;;  %p1334_p6 = scmp.lt.u32.totalorder %s1332_s2, %s1327_s23 }
  0x63   : > { %p1336_p11 = scmp.lt.u32.totalorder %s1327_s23, %s1689_s14 }
  0x64   : > { %p1330_p1 = pnand %p1329_p5, %p1328_p0  ;;  %p1335_p12 = por %p1334_p6, %p1333_p2 }
  0x66   : > { %p1331_p3 = pneg %p1330_p1  ;;  %p1337_p9 = por %p1336_p11, %p1335_p12 }
  0x68   : > { %p1338_p8 = pnand %p1337_p9, %p1331_p3 }
  0x6a   : > { %1341 = shalt.err (!%p1338_p8)
}
  0x6b   : > { %s1342_s6 = scalar_lea.vmem %s1691_s5, 1024  ;;  %s1496_s12 = smov [#allocation2]  }
  0x6c   : > { %p1343_p0 = scmp.ne.s32.totalorder %s1691_s5, %s1342_s6  ;;  %s1347_s8 = sshll.u32 %s1496_s12, 4  ;;  %s1348_s8 = int_to_ptr.vmem [resolvable:$false] %s1347_s8 }
  0x6d   : > { %s1349_s3 = scalar_lea.vmem %s1348_s8, 2048  ;;  %p1350_p4 = scmp.lt.s32.totalorder %s1691_s5, %s1348_s8 }
  0x6e   : > { %p1345_p1 = pnand %p1343_p0, %p1329_p5  ;;  %p1351_p2 = scmp.lt.s32.totalorder %s1349_s3, %s1342_s6 }
  0x70   : > { %p1346_p7 = pneg %p1345_p1  ;;  %p1352_p6 = por %p1351_p2, %p1350_p4 }
  0x72   : > { %p1353_p12 = pnand %p1352_p6, %p1346_p7 }
  0x74   : > { %1356 = shalt.err (!%p1353_p12)
}
  0x75   : > { %s2218_s2 = smov 4   ;;  %s2219_s23 = smov 64  }
  0x76   : > { %1169 = dma.hbm_to_vmem [thread:$0]  (!%p1695_p13), %s1689_s14, 1024, %s1691_s5, %s1704_s29, %s2219_s23, %s2219_s23, %s2218_s2  }
  0x77   : > { %s55_s11 = sadd.s32 1, %s1664_s7  ;;  %s59_s28 = sadd.s32 1, %s1474_s17 }
  0x78   : > { %s56_s30 = ssub.s32 %s1664_s7, %s55_s11  ;;  %p66_p8 = scmp.ne.s32.totalorder %s1474_s17, %s1470_s16 }
  0x79   : > { %p57_p4 = scmp.eq.s32.totalorder %s56_s30, 0  ;;  %s209_s15 = sand.u32 1, %s1490_s21  }
  0x7a   : > { %s211_s6 = sand.u32 1, %s1474_s17   ;;  %s1746_s8 = scalar_lea.hbm %s1702_s13, 1024 }
  0x7b   : > { %s1743_s12 = scalar_select %p57_p4, %s1474_s17, %s59_s28  }
  0x7c   : > { %p2220_p7 = scmp.eq.s32.totalorder %s1490_s21, 0  ;;  %s1058_s3 = sshll.u32 %s211_s6, 6 }
  0x7d   : > { %p2221_p5 = scmp.lt.s32.totalorder %s1490_s21, 2  ;;  %s213_s5 = scalar_lea.vmem [#allocation5], %s1058_s3 }
  0x7e   : > { %p68_p9 = por %p66_p8, %p2220_p7  ;;  %s221_s29 = sshll.u32 %s213_s5, 4  ;;  %s1756_s29 = int_to_ptr.vmem [resolvable:$true] %s221_s29 }
  0x7f   : > { %s1758_s11 = scalar_lea.sflag [#allocation6], %s209_s15  ;;  %s1387_s30 = scalar_lea.hbm %s1702_s13, 2048 }
  0x80   : > { %p1752_p13 = pnand %p2221_p5, %p68_p9  ;;  %p1358_p3 = scmp.ne.s32.totalorder %s1746_s8, %s1387_s30 }
  0x81   : > { %s1362_s0 = scalar_lea.hbm %s2187_s1, 3072  ;;  %p1363_p2 = scmp.lt.u32.totalorder %s1746_s8, %s2187_s1 }
  0x82   : > { %p1359_p11 = pneg %p1752_p13  ;;  %p1364_p6 = scmp.lt.u32.totalorder %s1362_s0, %s1387_s30 }
  0x83   : > { %p1366_p4 = scmp.lt.u32.totalorder %s1387_s30, %s1746_s8 }
  0x84   : > { %p1360_p0 = pnand %p1359_p11, %p1358_p3  ;;  %p1365_p12 = por %p1364_p6, %p1363_p2 }
  0x86   : > { %p1361_p1 = pneg %p1360_p0  ;;  %p1367_p8 = por %p1366_p4, %p1365_p12 }
  0x88   : > { %p1368_p7 = pnand %p1367_p8, %p1361_p1 }
  0x8a   : > { %1371 = shalt.err (!%p1368_p7)
}
  0x8b   : > { %s1372_s13 = scalar_lea.vmem %s1756_s29, 1024  ;;  %s1497_s15 = smov [#allocation5]  }
  0x8c   : > { %p1373_p9 = scmp.ne.s32.totalorder %s1756_s29, %s1372_s13  ;;  %s1377_s3 = sshll.u32 %s1497_s15, 4  ;;  %s1378_s3 = int_to_ptr.vmem [resolvable:$false] %s1377_s3 }
  0x8d   : > { %s1379_s20 = scalar_lea.vmem %s1378_s3, 2048  ;;  %p1380_p0 = scmp.lt.s32.totalorder %s1756_s29, %s1378_s3 }
  0x8e   : > { %p1375_p5 = pnand %p1373_p9, %p1359_p11  ;;  %p1381_p2 = scmp.lt.s32.totalorder %s1379_s20, %s1372_s13 }
  0x90   : > { %p1376_p3 = pneg %p1375_p5  ;;  %p1382_p6 = por %p1381_p2, %p1380_p0 }
  0x92   : > { %p1383_p12 = pnand %p1382_p6, %p1376_p3 }
  0x94   : > { %1386 = shalt.err (!%p1383_p12)
}
  0x95   : > { %1172 = dma.hbm_to_vmem [thread:$0]  (!%p1752_p13), %s1746_s8, 1024, %s1756_s29, %s1758_s11, %s2219_s23, %s2219_s23, %s2218_s2  }
  0x96   : > { %233 = sbr.rel (%p1590_p10) target bundleno = 603 (0x25b), region = 36  ;;  %s1792_s0 = sand.u32 (!%p1590_p10), 1, %s1482_s19  }
  0x97   : > { %s1061_s10 = sshll.u32 (!%p1590_p10), %s1792_s0, 6  ;;  %s236_s5 = scalar_lea.sflag (!%p1590_p10), [#allocation3], %s1792_s0 }
  0x98   : > { %s1796_s30 = scalar_lea.vmem (!%p1590_p10), [#allocation2], %s1061_s10  ;;  %p2223_p11 = scmp.ne.s32.totalorder (!%p1590_p10), %s2206_s24, 0 }
  0x9d   : > { %1445 = dma.done.wait (%p2223_p11), %s236_s5, 1024  }
  0x9e   : > { %1447 = vsyncadd (%p2223_p11), %s236_s5, 4294966272  ;;  %s244_s27 = sand.u32 1, %s1564_s22   ;;  %s246_s2 = sand.u32 1, %s1470_s16  }
  0x9f   : > { %s1804_s23 = sshll.u32 %s246_s2, 6  ;;  %s245_s8 = scalar_lea.sflag [#allocation6], %s244_s27 }
  0xa0   : > { %s248_s14 = scalar_lea.vmem [#allocation5], %s1804_s23  ;;  %p2224_p10 = scmp.ne.s32.totalorder %s2207_s25, 0 }
  0xa2   : > { %1449 = dma.done.wait (%p2224_p10), %s245_s8, 1024  }
  0xa3   : > { %1451 = vsyncadd (%p2224_p10), %s245_s8, 4294966272  ;;  %p2225_p13 = scmp.eq.s32.totalorder %s1564_s22, 0 }
  0xa5   : > { %1453 = dma.done.wait (%p2225_p13), [#allocation6], 320   ;;  %p2226_p1 = pmov %p2225_p13 }
  0xa7   : > { %1455 = vsyncadd (%p2226_p1), [#allocation6], 4294966976  ;;  %p2227_p4 = pmov %p2226_p1 }
  0xa8   : > { %p2228_p8 = pmov %p2226_p1 }
  0xa9   : > { %1457 = dma.done.wait (%p2227_p4), [#allocation9], 16  }
  0xaa   : > { %1459 = vsyncadd (%p2228_p8), [#allocation9], 4294967280  ;;  %v1820_v0 = vld [vmem:[%s1796_s30 + $0x20] sm:$0xf]  ;;  %v300_v1 = vld [vmem:[%s1796_s30 + $0x24] sm:$0xf] }
  0xab   : > { %v1824_v2 = vcombine.low %v1820_v0, %v300_v1  ;;  %v291_v3 = vld [vmem:[%s1796_s30] sm:$0xf]  ;;  %v292_v4 = vld [vmem:[%s1796_s30 + $0x4] sm:$0xf]  ;;  %v1829_v5 = vld [vmem:[%s1796_s30 + $0x8] sm:$0xf] }
  0xac   : > { %v1831_v6 = vcombine.low %v291_v3, %v292_v4  ;;  %v301_v7 = vld [vmem:[%s1796_s30 + $0x28] sm:$0xf]  ;;  %v302_v8 = vld [vmem:[%s1796_s30 + $0x2c] sm:$0xf]  ;;  %s1498_s24 = smov 4   ;;  %v1075_v31 = vcombine.low %v292_v4, %v1829_v5  ;;  %s1499_s25 = smov 8  }
  0xad   : > { %566 = vrot.lane.b32.xlu1 %v1824_v2, %s1498_s24  ;;  %v303_v9 = vld [vmem:[%s1796_s30 + $0x30] sm:$0xf]  ;;  %v304_v10 = vld [vmem:[%s1796_s30 + $0x34] sm:$0xf]  ;;  %v1839_v11 = vcombine.low %v301_v7, %v302_v8  ;;  %v294_v12 = vld [vmem:[%s1796_s30 + $0xc] sm:$0xf]  ;;  %v1872_v35 = vcombine.low %v300_v1, %v301_v7 }
  0xae   : > { %558 = vrot.lane.b32.xlu0 %v1831_v6, %s1498_s24  ;;  %v1844_v13 = vcombine.low %v303_v9, %v304_v10  ;;  %v295_v14 = vld [vmem:[%s1796_s30 + $0x10] sm:$0xf]  ;;  %v296_v15 = vld [vmem:[%s1796_s30 + $0x14] sm:$0xf]  ;;  %v1849_v16 = vcombine.low %v1829_v5, %v294_v12  ;;  %v350_v18 = vshrl.u32 %v1831_v6, 16  ;;  %v352_v19 = vshll.u32 %v1831_v6, 16 }
  0xaf   : > { %v1851_v17 = vcombine.low %v295_v14, %v296_v15  ;;  %v389_v20 = vshll.u32 %v1839_v11, 16  ;;  %v393_v23 = vshrl.u32 %v1839_v11, 16  ;;  %v381_v28 = vshll.u32 %v1824_v2, 16  ;;  %v297_v45 = vld [vmem:[%s1796_s30 + $0x18] sm:$0xf]  ;;  %v1268_v50 = vld [vmem:[#allocation7] sm:$0xff]  }
  0xb0   : > { %v357_v21 = vshll.u32 %v1849_v16, 16  ;;  %v361_v22 = vshrl.u32 %v1849_v16, 16  ;;  %v397_v24 = vshll.u32 %v1844_v13, 16  ;;  %v354_v26 = vrot.slane %v352_v19, 1  ;;  %v305_v49 = vld [vmem:[%s1796_s30 + $0x38] sm:$0xf]  ;;  %1115 = vmatprep.subr.bf16.mxu0 %v1268_v50  ;;  %1137 = vmatprep.subr.bf16.mxu1 %v1268_v50 }
  0xb1   : > { %568 = vrot.lane.b32.xlu1 %v1839_v11, %s1498_s24  ;;  %v365_v25 = vshll.u32 %v1851_v17, 16  ;;  %v391_v27 = vrot.slane %v389_v20, 1  ;;  %vm348_vm0 = vsmask.f32 7424  ;;  %v385_v30 = vshrl.u32 %v1824_v2, 16  ;;  %1116 = vmatpush3.bf16.msra.mxu0 %v1268_v50  ;;  %v1269_v59 = vld [vmem:[#allocation7 + $0x8] sm:$0xff]  }
  0xb2   : > { %560 = vrot.lane.b32.xlu0 %v1849_v16, %s1498_s24  ;;  %v359_v29 = vrot.slane %v357_v21, 1  ;;  %v355_v33 = vor.u32 %v354_v26, %v350_v18  ;;  %v1870_v34 = vrot.slane %v381_v28, 1  ;;  %v1874_v38 = vrot.slane %v397_v24, 1  ;;  %1140 = vmatpush3.bf16.msra.mxu1 %v1268_v50  ;;  %s1500_s29 = smov 12   ;;  %v306_v21 = vld [vmem:[%s1796_s30 + $0x3c] sm:$0xf] }
  0xb3   : > { %v1868_v32 = vrot.slane %v365_v25, 1  ;;  %v395_v37 = vor.u32 %v393_v23, %v391_v27  ;;  %v1881_v42 = vcombine.low %v294_v12, %v295_v14  ;;  %v437_v44 = vshll.u32 %v1075_v31, 16  ;;  %1117 = vmatprep.subr.bf16.mxu0 %v1269_v59  ;;  %1138 = vmatprep.subr.bf16.mxu1 %v1269_v59  ;;  %s1501_s11 = smov 24   ;;  %s1502_s28 = smov 32  }
  0xb4   : > { %v363_v36 = vor.u32 %v361_v22, %v359_v29  ;;  %v360_v39 = vsel %vm348_vm0, %v355_v33, %v359_v29  ;;  %v387_v40 = vor.u32 %v385_v30, %v1870_v34  ;;  %v1886_v46 = vcombine.low %v302_v8, %v303_v9  ;;  %v516_v8 = vld [vmem:[%s1796_s30 + $0x4] sm:$0xe]  ;;  %v1270_v29 = vld [vmem:[#allocation7 + $0x10] ss:$0 sps:$4 sm:$0x33]   ;;  %s1065_s6 = sshll.u32 %s1792_s0, 7 }
  0xb5   : > { %v400_v47 = vsel %vm348_vm0, %v395_v37, %v1874_v38  ;;  %v466_v48 = vshll.u32 %v1872_v35, 16  ;;  %v435_v51 = vshrl.u32 %v1075_v31, 16  ;;  %v439_v52 = vrot.slane %v437_v44, 1  ;;  %1118 = vmatpush3.bf16.msra.mxu0 %v1269_v59  ;;  %s2099_s13 = scalar_lea.vmem [#allocation10], %s1065_s6  ;;  %s1103_s15 = sshll.u32 %s1564_s22, 11 }
  0xb6   : > { %v368_v41 = vsel %vm348_vm0, %v363_v36, %v1868_v32  ;;  %542 = vrot.lane.b32.xlu0 %v360_v39, %s1499_s25  ;;  %v392_v43 = vsel %vm348_vm0, %v387_v40, %v391_v27  ;;  %v442_v53 = vshll.u32 %v1881_v42, 16  ;;  %v1895_v54 = vcombine.low %v296_v15, %v297_v45  ;;  %1141 = vmatpush3.bf16.msra.mxu1 %v1269_v59  ;;  %v1918_v15 = vld [vmem:[%s1796_s30 + $0x1c] sm:$0xf]  ;;  %s934_s3 = sshll.u32 %s2099_s13, 4  ;;  %s2125_s10 = scalar_lea.hbm %s2190_s4, %s1103_s15  ;;  %s2129_s3 = int_to_ptr.vmem [resolvable:$true] %s934_s3 }
  0xb7   : > { %544 = vrot.lane.b32.xlu1 %v368_v41, %s1499_s25  ;;  %v1897_v55 = vrot.slane %v466_v48, 1  ;;  %v470_v56 = vshrl.u32 %v1872_v35, 16  ;;  %v474_v57 = vshll.u32 %v1886_v46, 16  ;;  %v1901_v58 = vcombine.low %v304_v10, %v305_v49  ;;  %s921_s5 = scalar_lea.sflag [#allocation4], %s1792_s0  ;;  %s1388_s30 = scalar_lea.vmem %s2129_s3, 2048 }
  0xb8   : > { %v440_v60 = vor.u32 %v439_v52, %v435_v51  ;;  %v444_v61 = vrot.slane %v442_v53, 1  ;;  %v446_v62 = vshrl.u32 %v1881_v42, 16  ;;  %v450_v63 = vshll.u32 %v1895_v54, 16  ;;  %p1389_p7 = scmp.ne.s32.totalorder %s2129_s3, %s1388_s30  ;;  %p2229_p9 = scmp.ne.s32.totalorder %s2214_s9, 0 }
  0xb9   : > { %v472_v1 = vor.u32 %v470_v56, %v1897_v55  ;;  %v476_v3 = vrot.slane %v474_v57, 1  ;;  %v478_v4 = vshrl.u32 %v1886_v46, 16  ;;  %v482_v7 = vshll.u32 %v1901_v58, 16  ;;  %s1503_s27 = smov [#allocation10]  }
  0xba   : > { %550 = vrot.lane.b32.xlu0 %v392_v43, %s1499_s25  ;;  %v445_v9 = vsel %vm348_vm0, %v440_v60, %v444_v61  ;;  %v448_v10 = vor.u32 %v446_v62, %v444_v61  ;;  %v1914_v12 = vrot.slane %v450_v63, 1  ;;  %v1084_v14 = vcombine.low %v516_v8, %v1829_v5  ;;  %v1267_v63 = vld [vmem:[%s248_s14] sm:$0x1f]   ;;  %p1390_p5 = pnand %p1389_p7, %p2229_p9  ;;  %s1392_s2 = sshll.u32 %s1503_s27, 4  ;;  %s1393_s2 = int_to_ptr.vmem [resolvable:$false] %s1392_s2 }
  0xbb   : > { %552 = vrot.lane.b32.xlu1 %v400_v47, %s1499_s25  ;;  %v477_v18 = vsel %vm348_vm0, %v472_v1, %v476_v3  ;;  %v480_v19 = vor.u32 %v478_v4, %v476_v3  ;;  %v1921_v20 = vrot.slane %v482_v7, 1  ;;  %vm520_vm1 = vcmask 1046528   ;;  %s1394_s23 = scalar_lea.vmem %s1393_s2, 4096  ;;  %p1395_p0 = scmp.lt.s32.totalorder %s2129_s3, %s1393_s2 }
  0xbc   : > { %v1926_v22 = vcombine.low %v297_v45, %v1918_v15  ;;  %v453_v5 = vsel %vm348_vm0, %v448_v10, %v1914_v12  ;;  %v521_v23 = vrot.slane %v1084_v14, 1  ;;  %v522_v24 = vrot.slane %v1881_v42, 1  ;;  %v1265_v42 = vld [vmem:[%s248_s14] ss:$0 sps:$4 sm:$0x11]   ;;  %p1391_p3 = pneg %p1390_p5  ;;  %p1396_p2 = scmp.lt.s32.totalorder %s1394_s23, %s1388_s30 }
  0xbd   : > { %v1932_v25 = vcombine.low %v305_v49, %v306_v21  ;;  %v485_v26 = vsel %vm348_vm0, %v480_v19, %v1921_v20  ;;  %v528_v27 = vrot.slane %v1872_v35, 1  ;;  %v530_v28 = vrot.slane %v1886_v46, 1 }
  0xbe   : > { %574 = vrot.lane.b32.xlu0 %v360_v39, %s1500_s29  ;;  %v532_v30 = vrot.slane %v1901_v58, 1  ;;  %v524_v31 = vrot.slane %v1895_v54, 1  ;;  %v523_v33 = vsel %vm520_vm1, %v521_v23, %v522_v24  ;;  %v369_v36 = vshrl.u32 %v1851_v17, 16  ;;  %p1397_p6 = por %p1396_p2, %p1395_p0 }
  0xbf   : > { %582 = vrot.lane.b32.xlu1 %v392_v43, %s1500_s29  ;;  %v373_v37 = vshll.u32 %v1926_v22, 16  ;;  %vm771_vm2 = vcmask 1041408   ;;  %v531_v39 = vsel %vm520_vm1, %v528_v27, %v530_v28  ;;  %v401_v40 = vshrl.u32 %v1844_v13, 16 }
  0xc0   : > { %1143 = vmatprep.subr.msk.bf16.mxu0 %vm771_vm2, %v1270_v29  ;;  %1144 = vmatprep.subr.msk.bf16.mxu1 %vm771_vm2, %v1270_v29  ;;  %v773_v43 = vsel %vm771_vm2, %v1270_v29, 0  ;;  %v533_v44 = vsel %vm520_vm1, %v530_v28, %v532_v30  ;;  %v525_v45 = vsel %vm520_vm1, %v522_v24, %v524_v31  ;;  %v371_v46 = vor.u32 %v369_v36, %v1868_v32  ;;  %p1398_p12 = pnand %p1397_p6, %p1391_p3 }
  0xc1   : > { %1120 = vmatpush3.bf16.msra.mxu0 %v773_v43  ;;  %1142 = vmatpush3.bf16.msra.mxu1 %v773_v43  ;;  %v377_v48 = vshrl.u32 %v1926_v22, 16  ;;  %v403_v49 = vor.u32 %v401_v40, %v1874_v38  ;;  %v409_v51 = vshrl.u32 %v1932_v25, 16  ;;  %v417_v52 = vshll.u32 %v1265_v42, 16 }
  0xc2   : > { %576 = vrot.lane.b32.xlu0 %v368_v41, %s1500_s29  ;;  %v405_v41 = vshll.u32 %v1932_v25, 16  ;;  %vm421_vm3 = vcmask 1047552   ;;  %v1078_v61 = vcombine.low %v1918_v15, %v1820_v0  ;;  %v1082_v62 = vcombine.low %v306_v21, %v306_v21 }
  0xc3   : > { %584 = vrot.lane.b32.xlu1 %v400_v47, %s1500_s29  ;;  %v375_v47 = vrot.slane %v373_v37, 1  ;;  %v419_v59 = vrot.slane %v417_v52, 1  ;;  %vm422_vm4 = vmand %vm421_vm3, %vm348_vm0  ;;  %v454_v1 = vshrl.u32 %v1895_v54, 16  ;;  %v504_v7 = vshrl.u32 %v1267_v63, 16 }
  0xc4   : > { %v407_v50 = vrot.slane %v405_v41, 1  ;;  %v458_v3 = vshll.u32 %v1078_v61, 16  ;;  %v490_v4 = vshll.u32 %v1082_v62, 16  ;;  %v507_v0 = vshll.u32 %v1267_v63, 16 }
  0xc5   : > { %v376_v53 = vsel %vm348_vm0, %v371_v46, %v375_v47  ;;  %v379_v56 = vor.u32 %v377_v48, %v375_v47  ;;  %v462_v14 = vshrl.u32 %v1078_v61, 16  ;;  %v506_v19 = vrot.slane %v504_v7, 4 }
  0xc6   : > { %591 = vrot.lane.b32.xlu0 %v445_v9, %s1501_s11  ;;  %v408_v32 = vsel %vm348_vm0, %v403_v49, %v407_v50  ;;  %v411_v57 = vor.u32 %v409_v51, %v407_v50  ;;  %v456_v9 = vor.u32 %v454_v1, %v1914_v12  ;;  %v460_v10 = vrot.slane %v458_v3, 1 }
  0xc7   : > { %599 = vrot.lane.b32.xlu1 %v477_v18, %s1501_s11  ;;  %v384_v38 = vsel %vm348_vm0, %v379_v56, %v1870_v34  ;;  %v486_v34 = vshrl.u32 %v1901_v58, 16  ;;  %v492_v15 = vrot.slane %v490_v4, 1  ;;  %v494_v18 = vshrl.u32 %v1082_v62, 16 }
  0xc8   : > { %v423_v60 = vsel %vm422_vm4, %v411_v57, %v419_v59  ;;  %v509_v21 = vrot.slane %v507_v0, 5  ;;  %vm512_vm5 = vcmask 1043456   ;;  %vm513_vm6 = vsmask.f32 3328 }
  0xc9   : > { %v488_v8 = vor.u32 %v486_v34, %v1921_v20  ;;  %v464_v23 = vor.u32 %v462_v14, %v460_v10  ;;  %v496_v20 = vor.u32 %v494_v18, %v492_v15  ;;  %vm514_vm7 = vmand %vm512_vm5, %vm513_vm6  ;;  %v526_v28 = vrot.slane %v1078_v61, 1 }
  0xca   : > { %593 = vrot.lane.b32.xlu0 %v453_v5, %s1501_s11  ;;  %v461_v5 = vsel %vm348_vm0, %v456_v9, %v460_v10  ;;  %vm537_vm8 = vcmask 1042432   ;;  %vm624_vm9 = vcmask 64512   ;;  %vm641_vm10 = vcmask 97280  }
  0xcb   : > { %601 = vrot.lane.b32.xlu1 %v485_v26, %s1501_s11  ;;  %v493_v24 = vsel %vm348_vm0, %v488_v8, %v492_v15  ;;  %v510_v26 = vor.u32 %v509_v21, %v506_v19  ;;  %v469_v12 = vsel %vm348_vm0, %v464_v23, %v1897_v55  ;;  %v527_v36 = vsel %vm520_vm1, %v524_v31, %v526_v28 }
  0xcc   : > { %v529_v55 = vsel %vm520_vm1, %v526_v28, %v528_v27  ;;  %vm658_vm11 = vcmask 130048   ;;  %vm667_vm12 = vcmask 162816   ;;  %vm684_vm13 = vcmask 195584  }
  0xcd   : > { %v515_v29 = vsel %vm514_vm7, %v496_v20, %v510_v26  ;;  %vm701_vm14 = vcmask 228352   ;;  %vm710_vm15 = vcmask 261120   ;;  %vm754_vm0 = vcmask 293888  }
  0xce   : > { %608 = vrot.lane.b32.xlu0 %v523_v33, %s1502_s28  ;;  %v534_v33 = vrot.slane %v1082_v62, 1 }
  0xcf   : > { %616 = vrot.lane.b32.xlu1 %v531_v39, %s1502_s28  ;;  %v536_v39 = vrot.slane %v1267_v63, 5 }
  0xd0   : > { %v535_v37 = vsel %vm520_vm1, %v532_v30, %v534_v33 }
  0xd1   : > { %v540_v40 = vsel %vm537_vm8, %v534_v33, %v536_v39 }
  0xd2   : > { %610 = vrot.lane.b32.xlu0 %v525_v45, %s1502_s28 }
  0xd3   : > { %618 = vrot.lane.b32.xlu1 %v533_v44, %s1502_s28 }
  0xd6   : > { %546 = vrot.lane.b32.xlu0 %v376_v53, %s1499_s25 }
  0xd7   : > { %554 = vrot.lane.b32.xlu1 %v408_v32, %s1499_s25 }
  0xda   : > { %548 = vrot.lane.b32.xlu0 %v384_v38, %s1499_s25 }
  0xdb   : > { %556 = vrot.lane.b32.xlu1 %v423_v60, %s1499_s25 }
  0xde   : > { %562 = vrot.lane.b32.xlu0 %v1851_v17, %s1498_s24 }
  0xdf   : > { %570 = vrot.lane.b32.xlu1 %v1844_v13, %s1498_s24 }
  0xe2   : > { %564 = vrot.lane.b32.xlu0 %v1926_v22, %s1498_s24 }
  0xe3   : > { %572 = vrot.lane.b32.xlu1 %v1932_v25, %s1498_s24 }
  0xe6   : > { %578 = vrot.lane.b32.xlu0 %v376_v53, %s1500_s29 }
  0xe7   : > { %586 = vrot.lane.b32.xlu1 %v408_v32, %s1500_s29 }
  0xea   : > { %580 = vrot.lane.b32.xlu0 %v384_v38, %s1500_s29 }
  0xeb   : > { %588 = vrot.lane.b32.xlu1 %v423_v60, %s1500_s29 }
  0xee   : > { %595 = vrot.lane.b32.xlu0 %v461_v5, %s1501_s11 }
  0xef   : > { %603 = vrot.lane.b32.xlu1 %v493_v24, %s1501_s11 }
  0xf2   : > { %597 = vrot.lane.b32.xlu0 %v469_v12, %s1501_s11 }
  0xf3   : > { %605 = vrot.lane.b32.xlu1 %v515_v29, %s1501_s11 }
  0xf6   : > { %612 = vrot.lane.b32.xlu0 %v527_v36, %s1502_s28 }
  0xf7   : > { %620 = vrot.lane.b32.xlu1 %v535_v37, %s1502_s28 }
  0xfa   : > { %614 = vrot.lane.b32.xlu0 %v529_v55, %s1502_s28 }
  0xfb   : > { %622 = vrot.lane.b32.xlu1 %v540_v40, %s1502_s28 }
 0x11f   : > { %v567_v54 = vpop.permute.xlu1 %566 }
 0x120   : > { %v559_v31 = vpop.permute.xlu0 %558 }
 0x123   : > { %v569_v58 = vpop.permute.xlu1 %568 }
 0x124   : > { %v561_v41 = vpop.permute.xlu0 %560 }
 0x128   : > { %v543_v30 = vpop.permute.xlu0 %542 }
 0x129   : > { %v545_v42 = vpop.permute.xlu1 %544  ;;  %v626_v47 = vsel %vm624_vm9, %v1831_v6, %v543_v30 }
 0x12a   : > { %v643_v50 = vsel %vm641_vm10, %v626_v47, %v559_v31  ;;  %v628_v52 = vsel %vm624_vm9, %v1849_v16, %v545_v42 }
 0x12b   : > { %v659_v6 = vsel %vm658_vm11, %v643_v50, %v559_v31  ;;  %v645_v32 = vsel %vm641_vm10, %v628_v52, %v561_v41 }
 0x12c   : > { %v551_v43 = vpop.permute.xlu0 %550  ;;  %v660_v62 = vsel %vm658_vm11, %v645_v32, %v561_v41 }
 0x12d   : > { %v553_v44 = vpop.permute.xlu1 %552  ;;  %v634_v35 = vsel %vm624_vm9, %v1824_v2, %v551_v43 }
 0x12e   : > { %v651_v49 = vsel %vm641_vm10, %v634_v35, %v567_v54  ;;  %v636_v2 = vsel %vm624_vm9, %v1839_v11, %v553_v44 }
 0x12f   : > { %v663_v56 = vsel %vm658_vm11, %v651_v49, %v567_v54  ;;  %v653_v38 = vsel %vm641_vm10, %v636_v2, %v569_v58 }
 0x130   : > { %v575_v45 = vpop.permute.xlu0 %574  ;;  %v664_v63 = vsel %vm658_vm11, %v653_v38, %v569_v58 }
 0x131   : > { %v583_v46 = vpop.permute.xlu1 %582  ;;  %v669_v57 = vsel %vm667_vm12, %v659_v6, %v575_v45 }
 0x132   : > { %v677_v60 = vsel %vm667_vm12, %v663_v56, %v583_v46 }
 0x134   : > { %v577_v27 = vpop.permute.xlu0 %576 }
 0x135   : > { %v585_v48 = vpop.permute.xlu1 %584  ;;  %v671_v34 = vsel %vm667_vm12, %v660_v62, %v577_v27 }
 0x136   : > { %v679_v4 = vsel %vm667_vm12, %v664_v63, %v585_v48 }
 0x138   : > { %v592_v51 = vpop.permute.xlu0 %591 }
 0x139   : > { %v600_v53 = vpop.permute.xlu1 %599  ;;  %v686_v16 = vsel %vm684_vm13, %v669_v57, %v592_v51 }
 0x13a   : > { %v694_v11 = vsel %vm684_vm13, %v677_v60, %v600_v53  ;;  %v702_v1 = vsel %vm701_vm14, %v686_v16, %v592_v51 }
 0x13b   : > { %v706_v7 = vsel %vm701_vm14, %v694_v11, %v600_v53 }
 0x13c   : > { %v594_v59 = vpop.permute.xlu0 %593 }
 0x13d   : > { %v602_v61 = vpop.permute.xlu1 %601  ;;  %v688_v0 = vsel %vm684_vm13, %v671_v34, %v594_v59  ;;  %v2088_v34 = vld [vmem:[#allocation8] ss:$0 sm:$0xff] }
 0x13e   : > { %v696_v10 = vsel %vm684_vm13, %v679_v4, %v602_v61  ;;  %v703_v15 = vsel %vm701_vm14, %v688_v0, %v594_v59 }
 0x13f   : > { %v707_v19 = vsel %vm701_vm14, %v696_v10, %v602_v61 }
 0x140   : > { %v609_v3 = vpop.permute.xlu0 %608 }
 0x141   : > { %v617_v8 = vpop.permute.xlu1 %616  ;;  %v712_v9 = vsel %vm710_vm15, %v702_v1, %v609_v3 }
 0x142   : > { %1121 = vmatprep.mubr.msk.bf16.mxu0 %vm754_vm0, %v712_v9  ;;  %v720_v14 = vsel %vm710_vm15, %v706_v7, %v617_v8 }
 0x143   : > { %1129 = vmatprep.mubr.msk.bf16.mxu1 %vm754_vm0, %v720_v14 }
 0x144   : > { %v611_v18 = vpop.permute.xlu0 %610 }
 0x145   : > { %v619_v21 = vpop.permute.xlu1 %618  ;;  %v714_v5 = vsel %vm710_vm15, %v703_v15, %v611_v18 }
 0x146   : > { %v722_v23 = vsel %vm710_vm15, %v707_v19, %v619_v21  ;;  %1122 = vmatmul.mubr.msk.bf16.vlgmr.msra.gmra.mrb[0].mxu0 %vm754_vm0, %v714_v5 }
 0x147   : > { %1130 = vmatmul.mubr.msk.bf16.vlgmr.msra.gmra.mrb[0].mxu1 %vm754_vm0, %v722_v23 }
 0x148   : > { %v547_v24 = vpop.permute.xlu0 %546 }
 0x149   : > { %v555_v20 = vpop.permute.xlu1 %554  ;;  %v630_v54 = vsel %vm624_vm9, %v1851_v17, %v547_v24 }
 0x14a   : > { %v638_v31 = vsel %vm624_vm9, %v1844_v13, %v555_v20 }
 0x14c   : > { %v549_v26 = vpop.permute.xlu0 %548 }
 0x14d   : > { %v557_v12 = vpop.permute.xlu1 %556  ;;  %v632_v43 = vsel %vm624_vm9, %v1926_v22, %v549_v26 }
 0x14e   : > { %v640_v45 = vsel %vm624_vm9, %v1932_v25, %v557_v12 }
 0x150   : > { %v563_v28 = vpop.permute.xlu0 %562 }
 0x151   : > { %v571_v29 = vpop.permute.xlu1 %570  ;;  %v647_v58 = vsel %vm641_vm10, %v630_v54, %v563_v28 }
 0x152   : > { %v655_v30 = vsel %vm641_vm10, %v638_v31, %v571_v29  ;;  %v661_v44 = vsel %vm658_vm11, %v647_v58, %v563_v28 }
 0x153   : > { %v665_v46 = vsel %vm658_vm11, %v655_v30, %v571_v29 }
 0x154   : > { %v565_v33 = vpop.permute.xlu0 %564 }
 0x155   : > { %v573_v36 = vpop.permute.xlu1 %572  ;;  %v649_v17 = vsel %vm641_vm10, %v632_v43, %v565_v33 }
 0x156   : > { %v657_v27 = vsel %vm641_vm10, %v640_v45, %v573_v36  ;;  %v662_v50 = vsel %vm658_vm11, %v649_v17, %v565_v33 }
 0x157   : > { %v666_v25 = vsel %vm658_vm11, %v657_v27, %v573_v36 }
 0x158   : > { %v579_v37 = vpop.permute.xlu0 %578 }
 0x159   : > { %v587_v39 = vpop.permute.xlu1 %586  ;;  %v673_v13 = vsel %vm667_vm12, %v661_v44, %v579_v37 }
 0x15a   : > { %v681_v47 = vsel %vm667_vm12, %v665_v46, %v587_v39 }
 0x15c   : > { %v581_v55 = vpop.permute.xlu0 %580 }
 0x15d   : > { %v589_v40 = vpop.permute.xlu1 %588  ;;  %v675_v51 = vsel %vm667_vm12, %v662_v50, %v581_v55 }
 0x15e   : > { %v683_v2 = vsel %vm667_vm12, %v666_v25, %v589_v40 }
 0x160   : > { %v596_v41 = vpop.permute.xlu0 %595 }
 0x161   : > { %v604_v42 = vpop.permute.xlu1 %603  ;;  %v690_v48 = vsel %vm684_vm13, %v673_v13, %v596_v41 }
 0x162   : > { %v698_v22 = vsel %vm684_vm13, %v681_v47, %v604_v42  ;;  %v704_v52 = vsel %vm701_vm14, %v690_v48, %v596_v41 }
 0x163   : > { %v708_v56 = vsel %vm701_vm14, %v698_v22, %v604_v42 }
 0x164   : > { %v598_v35 = vpop.permute.xlu0 %597 }
 0x165   : > { %v606_v49 = vpop.permute.xlu1 %605  ;;  %v692_v6 = vsel %vm684_vm13, %v675_v51, %v598_v35 }
 0x166   : > { %v700_v59 = vsel %vm684_vm13, %v683_v2, %v606_v49  ;;  %v705_v60 = vsel %vm701_vm14, %v692_v6, %v598_v35 }
 0x167   : > { %v709_v61 = vsel %vm701_vm14, %v700_v59, %v606_v49 }
 0x168   : > { %v613_v53 = vpop.permute.xlu0 %612 }
 0x169   : > { %v621_v32 = vpop.permute.xlu1 %620  ;;  %v716_v57 = vsel %vm710_vm15, %v704_v52, %v613_v53 }
 0x16a   : > { %v724_v38 = vsel %vm710_vm15, %v708_v56, %v621_v32  ;;  %1125 = vmatprep.mubr.msk.bf16.mxu0 %vm754_vm0, %v716_v57 }
 0x16b   : > { %1133 = vmatprep.mubr.msk.bf16.mxu1 %vm754_vm0, %v724_v38 }
 0x16c   : > { %v615_v16 = vpop.permute.xlu0 %614 }
 0x16d   : > { %v623_v11 = vpop.permute.xlu1 %622  ;;  %v718_v62 = vsel %vm710_vm15, %v705_v60, %v615_v16 }
 0x16e   : > { %v726_v63 = vsel %vm710_vm15, %v709_v61, %v623_v11  ;;  %1126 = vmatmul.mubr.msk.bf16.gmra.mrb[4].mxu0 %vm754_vm0, %v718_v62 }
 0x16f   : > { %1134 = vmatmul.mubr.msk.bf16.gmra.mrb[4].mxu1 %vm754_vm0, %v726_v63 }
 0x219   : > { %v1123_v1 = vpop.f32.mrb[0].mxu0 }
 0x21a   : > { %v818_v3 = vadd.f32 %v1123_v1, %v2088_v34  ;;  %v1131_v4 = vpop.f32.mrb[0].mxu1  ;;  %v809_v7 = vpop.f32.mrb[1].mxu0 }
 0x21b   : > { %v850_v0 = vadd.f32 %v1131_v4, %v2088_v34  ;;  %v810_v8 = vadd.f32 %v2088_v34, %v809_v7  ;;  %v841_v9 = vpop.f32.mrb[1].mxu1  ;;  %v1124_v10 = vpop.f32.mrb[2].mxu0 }
 0x21c   : > { %v874_v14 = vmul.f32 0.2, %v818_v3  ;;  %v842_v15 = vadd.f32 %v2088_v34, %v841_v9  ;;  %v821_v18 = vadd.f32 %v1124_v10, %v2088_v34  ;;  %v1132_v19 = vpop.f32.mrb[2].mxu1  ;;  %v812_v21 = vpop.f32.mrb[3].mxu0 }
 0x21d   : > { %v882_v5 = vmul.f32 0.2, %v850_v0  ;;  %v872_v23 = vmul.f32 0.2, %v810_v8  ;;  %v853_v24 = vadd.f32 %v1132_v19, %v2088_v34  ;;  %v813_v20 = vadd.f32 %v2088_v34, %v812_v21  ;;  %v844_v26 = vpop.f32.mrb[3].mxu1 }
 0x21e   : > { %v890_v12 = vmax.f32 %v818_v3, %v874_v14  ;;  %v880_v28 = vmul.f32 0.2, %v842_v15  ;;  %v875_v29 = vmul.f32 0.2, %v821_v18  ;;  %v845_v33 = vadd.f32 %v2088_v34, %v844_v26 }
 0x21f   : > { %v898_v36 = vmax.f32 %v850_v0, %v882_v5  ;;  %v888_v37 = vmax.f32 %v810_v8, %v872_v23  ;;  %v883_v39 = vmul.f32 0.2, %v853_v24  ;;  %v873_v55 = vmul.f32 0.2, %v813_v20 }
 0x220   : > { %906 = vst [vmem:[%s2099_s13 + $0x10] sm:$0xff] %v890_v12  ;;  %v896_v40 = vmax.f32 %v842_v15, %v880_v28  ;;  %v891_v54 = vmax.f32 %v821_v18, %v875_v29  ;;  %v881_v31 = vmul.f32 0.2, %v845_v33 }
 0x221   : > { %914 = vst [vmem:[%s2099_s13 + $0x50] sm:$0xff] %v898_v36  ;;  %904 = vst [vmem:[%s2099_s13] sm:$0xff] %v888_v37  ;;  %v899_v58 = vmax.f32 %v853_v24, %v883_v39  ;;  %v889_v41 = vmax.f32 %v813_v20, %v873_v55 }
 0x222   : > { %912 = vst [vmem:[%s2099_s13 + $0x40] sm:$0xff] %v896_v40  ;;  %907 = vst [vmem:[%s2099_s13 + $0x18] sm:$0xff] %v891_v54  ;;  %v897_v30 = vmax.f32 %v845_v33, %v881_v31 }
 0x223   : > { %915 = vst [vmem:[%s2099_s13 + $0x58] sm:$0xff] %v899_v58  ;;  %905 = vst [vmem:[%s2099_s13 + $0x8] sm:$0xff] %v889_v41 }
 0x224   : > { %913 = vst [vmem:[%s2099_s13 + $0x48] sm:$0xff] %v897_v30 }
 0x241   : > { %v1127_v42 = vpop.f32.mrb[4].mxu0 }
 0x242   : > { %v834_v43 = vadd.f32 %v1127_v42, %v2088_v34  ;;  %v1135_v44 = vpop.f32.mrb[4].mxu1  ;;  %v825_v45 = vpop.f32.mrb[5].mxu0 }
 0x243   : > { %v866_v46 = vadd.f32 %v1135_v44, %v2088_v34  ;;  %v826_v17 = vadd.f32 %v2088_v34, %v825_v45  ;;  %v857_v13 = vpop.f32.mrb[5].mxu1  ;;  %v1128_v35 = vpop.f32.mrb[6].mxu0 }
 0x244   : > { %v878_v27 = vmul.f32 0.2, %v834_v43  ;;  %v858_v47 = vadd.f32 %v2088_v34, %v857_v13  ;;  %v837_v48 = vadd.f32 %v1128_v35, %v2088_v34  ;;  %v1136_v49 = vpop.f32.mrb[6].mxu1  ;;  %v828_v22 = vpop.f32.mrb[7].mxu0 }
 0x245   : > { %v886_v50 = vmul.f32 0.2, %v866_v46  ;;  %v876_v25 = vmul.f32 0.2, %v826_v17  ;;  %v869_v51 = vadd.f32 %v1136_v49, %v2088_v34  ;;  %v829_v52 = vadd.f32 %v2088_v34, %v828_v22  ;;  %v860_v53 = vpop.f32.mrb[7].mxu1 }
 0x246   : > { %v894_v2 = vmax.f32 %v834_v43, %v878_v27  ;;  %v884_v56 = vmul.f32 0.2, %v858_v47  ;;  %v879_v6 = vmul.f32 0.2, %v837_v48  ;;  %v861_v32 = vadd.f32 %v2088_v34, %v860_v53 }
 0x247   : > { %v902_v57 = vmax.f32 %v866_v46, %v886_v50  ;;  %v892_v59 = vmax.f32 %v826_v17, %v876_v25  ;;  %v887_v38 = vmul.f32 0.2, %v869_v51  ;;  %v877_v60 = vmul.f32 0.2, %v829_v52 }
 0x248   : > { %910 = vst [vmem:[%s2099_s13 + $0x30] sm:$0xff] %v894_v2  ;;  %v900_v16 = vmax.f32 %v858_v47, %v884_v56  ;;  %v895_v61 = vmax.f32 %v837_v48, %v879_v6  ;;  %v885_v11 = vmul.f32 0.2, %v861_v32 }
 0x249   : > { %918 = vst [vmem:[%s2099_s13 + $0x70] sm:$0xff] %v902_v57  ;;  %908 = vst [vmem:[%s2099_s13 + $0x20] sm:$0xff] %v892_v59  ;;  %v903_v62 = vmax.f32 %v869_v51, %v887_v38  ;;  %v893_v63 = vmax.f32 %v829_v52, %v877_v60 }
 0x24a   : > { %916 = vst [vmem:[%s2099_s13 + $0x60] sm:$0xff] %v900_v16  ;;  %911 = vst [vmem:[%s2099_s13 + $0x38] sm:$0xff] %v895_v61  ;;  %v901_v34 = vmax.f32 %v861_v32, %v885_v11 }
 0x24b   : > { %919 = vst [vmem:[%s2099_s13 + $0x78] sm:$0xff] %v903_v62  ;;  %909 = vst [vmem:[%s2099_s13 + $0x28] sm:$0xff] %v893_v63 }
 0x24c   : > { %917 = vst [vmem:[%s2099_s13 + $0x68] sm:$0xff] %v901_v34 }
 0x24d   : > { %1401 = shalt.err (!%p1398_p12)
}
 0x24e   : > { %s1402_s8 = scalar_lea.hbm %s2125_s10, 2048  ;;  %s1406_s29 = scalar_lea.hbm %s2190_s4, 4096 }
 0x24f   : > { %p1403_p11 = scmp.ne.s32.totalorder %s2125_s10, %s1402_s8  ;;  %p1407_p1 = scmp.lt.u32.totalorder %s2125_s10, %s2190_s4 }
 0x250   : > { %p1408_p4 = scmp.lt.u32.totalorder %s1406_s29, %s1402_s8  ;;  %p1410_p7 = scmp.lt.u32.totalorder %s1402_s8, %s2125_s10 }
 0x251   : > { %p1404_p10 = pnand %p1403_p11, %p2229_p9 }
 0x252   : > { %p1409_p8 = por %p1408_p4, %p1407_p1 }
 0x253   : > { %p1405_p13 = pneg %p1404_p10 }
 0x254   : > { %p1411_p5 = por %p1410_p7, %p1409_p8 }
 0x256   : > { %p1412_p3 = pnand %p1411_p5, %p1405_p13 }
 0x258   : > { %1415 = shalt.err (!%p1412_p3)
}
 0x259   : > { %s1504_s6 = smov 128  }
 0x25a   : > { %1157 = dma.vmem_to_hbm [thread:$0]  (%p2229_p9), %s2129_s3, 2048, %s2125_s10, %s921_s5, %s1504_s6, %s1504_s6, %s1499_s25  }
 0x25b PF: > { %s949_s13 = sand.u32 1, %s1478_s18   ;;  %p2230_p0 = scmp.ne.s32.totalorder %s2208_s26, 0 }
 0x25c   : > { %p2231_p2 = scmp.ge.s32.totalorder %s1490_s21, 2  ;;  %s950_s15 = scalar_lea.sflag [#allocation4], %s949_s13 }
 0x25e   : > { %p1174_p6 = pnand %p2231_p2, %p2230_p0 }
 0x260   : > { %1461 = dma.done.wait (!%p1174_p6), %s950_s15, 2048  }
 0x261   : > { %1463 = vsyncadd (!%p1174_p6), %s950_s15, 4294965248  ;;  %s2232_s9 = sld [smem:[#allocation16_spill]]  ;;  %s2233_s20 = sld [smem:[#allocation17_spill]] }
 0x262   : > { %p21_p9 = scmp.ge.s32.totalorder %s1664_s7, 4   ;;  %s2234_s15 = smov %s1470_s16 }
 0x263   : > { %s2235_s16 = smov %s1474_s17  ;;  %s2236_s17 = smov %s1743_s12 }
 0x264   : > { %s2237_s18 = smov %s1482_s19  ;;  %s2239_s21 = smov %s1664_s7 }
 0x265   :  { %23 = sbr.rel (!%p21_p9) target bundleno = 14 (0xe), region = 102 }
 0x267   : > { %s2238_s19 = smov %s2232_s9 }
 0x26c   :  { %955 = vsyncpa [#allocation3], 1 }
 0x26d   :  { %957 = vsyncpa [#allocation3 + $0x1], 1 }
 0x26e   :  { %958 = vsyncpa [#allocation6], 1 }
 0x26f   :  { %960 = vsyncpa [#allocation6 + $0x1], 1 }
 0x270   :  { %961 = vsyncpa [#allocation9], 1 }
 0x271   :  { %962 = vsyncpa [#allocation4], 1 }
 0x272   :  { %964 = vsyncpa [#allocation4 + $0x1], 1 }

</bundles_post_ra>
